<compile_context>
chip_gen: v5e
topology: v5e:2x2
jax: 0.10.0
libtpu: 0.0.40
codegen_flags: <defaults>
</compile_context>

<pallas_src>
import math
import functools

import jax
import jax.numpy as jnp
from jax.experimental import pallas as pl
from jax.experimental.pallas import tpu as pltpu


def _round_up(x, m):
    return ((x + m - 1) // m) * m


def _lm_head_kernel(x_ref, wd_ref, vec_ref, wv_ref, bv_ref, o_ref, h_ref, *,
                    eps):
    # x_ref:  (tm, H)  bf16      wd_ref: (H, H)  bf16
    # vec_ref:(3, H)   f32  rows = [dense_b, ln_gamma, ln_beta]
    # wv_ref: (H, tv)  bf16      bv_ref: (1, tv) f32
    # o_ref:  (tm, tv) out dtype h_ref:  (tm, H) bf16 scratch (post-LN acts)
    j = pl.program_id(1)

    # Compute dense -> gelu -> layernorm once per token tile; reuse for all
    # vocab tiles of the same token tile (j is the inner, "arbitrary" axis).
    @pl.when(j == 0)
    def _():
        h = jnp.dot(x_ref[...], wd_ref[...],
                    preferred_element_type=jnp.float32)
        h = h + vec_ref[0:1, :]                      # dense bias (f32)

        # exact gelu: x * 0.5 * (1 + erf(x / sqrt(2)))
        h = h * 0.5 * (1.0 + jax.lax.erf(h * (1.0 / math.sqrt(2.0))))

        # layer norm over hidden dim (f32 math)
        mean = jnp.mean(h, axis=-1, keepdims=True)
        centered = h - mean
        var = jnp.mean(centered * centered, axis=-1, keepdims=True)
        inv = jax.lax.rsqrt(var + eps)
        h = centered * inv * vec_ref[1:2, :] + vec_ref[2:3, :]

        h_ref[...] = h.astype(h_ref.dtype)           # keep bf16 for the MXU

    # decoder tile: (tm, H) x (H, tv) + bias, f32 accumulate, cast on store.
    out = jnp.dot(h_ref[...], wv_ref[...],
                  preferred_element_type=jnp.float32) + bv_ref[...]
    o_ref[...] = out.astype(o_ref.dtype)


def prepare_params(params, *, tv=2048):
    """One-time weight preparation (call OUTSIDE the per-step hot path).

    Casts the two matmul weights to bf16 and pads the decoder weight / bias
    along vocab to a multiple of the vocab tile, so roberta_lm_head never
    re-reads the (H, V) weight just to cast/pad it.
    """
    H = params["dense_w"].shape[0]
    V = params["decoder_w"].shape[1]
    tv = min(tv, _round_up(V, 128))
    V_pad = _round_up(V, tv)

    wd = params["dense_w"].astype(jnp.bfloat16)
    wv = params["decoder_w"].astype(jnp.bfloat16)
    bv = params["decoder_b"].astype(jnp.float32).reshape(1, V)
    if V_pad != V:
        wv = jnp.pad(wv, ((0, 0), (0, V_pad - V)))
        bv = jnp.pad(bv, ((0, 0), (0, V_pad - V)))

    # Stack the small per-feature vectors into a single (3, H) f32 array.
    vec = jnp.stack(
        [params["dense_b"].reshape(H).astype(jnp.float32),
         params["ln_g"].reshape(H).astype(jnp.float32),
         params["ln_b"].reshape(H).astype(jnp.float32)],
        axis=0)

    return {"wd": wd, "vec": vec, "wv": wv, "bv": bv,
            "H": H, "V": V, "V_pad": V_pad, "tv": tv}


def roberta_lm_head(features, prepped, *, eps=1e-5, tm=1024,
                    out_dtype=jnp.bfloat16,
                    vmem_limit_bytes=48 * 1024 * 1024):
    """features: [B, S, H], prepped: output of prepare_params -> [B, S, V].

    Defaults (tm=1024, tv=2048 via prepare_params, 48 MiB VMEM limit, bf16
    logits) are sized for H~1024 and fit all of v5e/v6e/v7x. On v6e (128 MiB
    physical VMEM) vmem_limit_bytes≈96 MiB with tm=1024 / tv=4096 is a
    further win; on v7x keep the limit below the 64 MiB physical VMEM.
    """
    B, S, H = features.shape
    assert H == prepped["H"]
    V, V_pad, tv = prepped["V"], prepped["V_pad"], prepped["tv"]
    T = B * S

    # Clamp the token tile to a multiple of 16 (bf16 sublane packing); pad T.
    tm = min(tm, _round_up(T, 16))
    T_pad = _round_up(T, tm)
    # Keep >= 2 token tiles when T is large so the "parallel" token axis can
    # shard across the two v7x TensorCores (no-op on single-TC v5e/v6e), but
    # never shrink tiles below 256 tokens (decoder-weight re-stream cost).
    if T > 512 and T_pad // tm < 2:
        tm = max(256, _round_up(pl.cdiv(T, 2), 16))
        T_pad = _round_up(T, tm)

    x = features.reshape(T, H)
    if T_pad != T:
        x = jnp.pad(x, ((0, T_pad - T), (0, 0)))
    x = x.astype(jnp.bfloat16)

    grid = (T_pad // tm, V_pad // tv)
    kernel = functools.partial(_lm_head_kernel, eps=eps)

    out = pl.pallas_call(
        kernel,
        out_shape=jax.ShapeDtypeStruct((T_pad, V_pad), out_dtype),
        grid_spec=pltpu.PrefetchScalarGridSpec(
            num_scalar_prefetch=0,
            grid=grid,
            in_specs=[
                pl.BlockSpec((tm, H), lambda i, j: (i, 0)),    # token tile
                pl.BlockSpec((H, H), lambda i, j: (0, 0)),     # dense weight
                pl.BlockSpec((3, H), lambda i, j: (0, 0)),     # bias/gamma/beta
                pl.BlockSpec((H, tv), lambda i, j: (0, j)),    # decoder weight tile
                pl.BlockSpec((1, tv), lambda i, j: (0, j)),    # decoder bias tile
            ],
            out_specs=pl.BlockSpec((tm, tv), lambda i, j: (i, j)),
            scratch_shapes=[pltpu.VMEM((tm, H), jnp.bfloat16)],
        ),
        compiler_params=pltpu.CompilerParams(
            # token axis sharded across TensorCores (v7x megacore); vocab axis
            # is the sequential reuse axis for the per-token-tile scratch.
            dimension_semantics=("parallel", "arbitrary"),
            vmem_limit_bytes=vmem_limit_bytes,
        ),
    )(x, prepped["wd"], prepped["vec"], prepped["wv"], prepped["bv"])

    out = out[:T, :V]
    return out.reshape(B, S, V)


def init_params(key, hidden_size, vocab_size):
    k1, k2, k3 = jax.random.split(key, 3)
    scale_h = 1.0 / math.sqrt(hidden_size)
    return {
        # stored [in, out] (transpose of torch nn.Linear.weight)
        "dense_w": jax.random.normal(k1, (hidden_size, hidden_size),
                                     jnp.float32) * scale_h,
        "dense_b": jax.random.normal(k2, (1, hidden_size), jnp.float32) * 0.02,
        "ln_g": jnp.ones((1, hidden_size), jnp.float32),
        "ln_b": jnp.zeros((1, hidden_size), jnp.float32),
        "decoder_w": jax.random.normal(k3, (hidden_size, vocab_size),
                                       jnp.float32) * scale_h,
        "decoder_b": jnp.zeros((1, vocab_size), jnp.float32),  # self.bias
    }


def _reference(features, params, eps=1e-5, match_bf16=True):
    """Pure-JAX reference. match_bf16=True mimics the kernel's bf16 matmul
    operands (f32 accumulate); match_bf16=False is the full-f32 module math."""
    x = features
    wd, wv = params["dense_w"], params["decoder_w"]
    if match_bf16:
        x = x.astype(jnp.bfloat16)
        wd = wd.astype(jnp.bfloat16)
        wv = wv.astype(jnp.bfloat16)
    h = jnp.dot(x, wd, preferred_element_type=jnp.float32) + params["dense_b"]
    h = h * 0.5 * (1.0 + jax.lax.erf(h / math.sqrt(2.0)))
    mu = jnp.mean(h, axis=-1, keepdims=True)
    var = jnp.mean((h - mu) ** 2, axis=-1, keepdims=True)
    h = (h - mu) * jax.lax.rsqrt(var + eps) * params["ln_g"] + params["ln_b"]
    if match_bf16:
        h = h.astype(jnp.bfloat16)
    return (jnp.dot(h, wv, preferred_element_type=jnp.float32)
            + params["decoder_b"])


if __name__ == "__main__":
    key = jax.random.PRNGKey(0)
    B, S, H, V = 2, 8, 32, 64   # batch, seq, hidden_size, vocab_size
    kf, kp = jax.random.split(key)

    features = jax.random.normal(kf, (B, S, H), jnp.float32)
    params = init_params(kp, H, V)
    prepped = prepare_params(params)          # one-time cast/pad, off hot path

    # --- f32-logits path: tight check vs the bf16-operand/f32-acc reference.
    logits = roberta_lm_head(features, prepped, out_dtype=jnp.float32)
    jax.block_until_ready(logits)
    assert logits.shape == (B, S, V)

    ref_bf16 = _reference(features, params, match_bf16=True)
    err = float(jnp.max(jnp.abs(logits - ref_bf16)))
    assert jnp.allclose(logits, ref_bf16, atol=2e-3, rtol=2e-3), err

    # Loose sanity check against the full-f32 module math (bf16 weights cause
    # small, expected deltas).
    ref_f32 = _reference(features, params, match_bf16=False)
    err32 = float(jnp.max(jnp.abs(logits - ref_f32)))
    assert jnp.allclose(logits, ref_f32, atol=1e-1, rtol=1e-1), err32

    # --- default bf16-logits path (halves writeback): looser tolerance.
    logits_bf16 = roberta_lm_head(features, prepped)
    jax.block_until_ready(logits_bf16)
    assert logits_bf16.dtype == jnp.bfloat16 and logits_bf16.shape == (B, S, V)
    err_b = float(jnp.max(jnp.abs(logits_bf16.astype(jnp.float32) - ref_bf16)))
    assert jnp.allclose(logits_bf16.astype(jnp.float32), ref_bf16,
                        atol=5e-2, rtol=5e-2), err_b

    print("KERNEL_OK")
</pallas_src>

<mosaic_0001>
module attributes {stable_mosaic.version = 11 : i64} {
  func.func @_lm_head_kernel(%arg0: i32, %arg1: i32, %arg2: memref<16x32xbf16, #tpu.memory_space<vmem>>, %arg3: memref<32x32xbf16, #tpu.memory_space<vmem>>, %arg4: memref<3x32xf32, #tpu.memory_space<vmem>>, %arg5: memref<32x128xbf16, #tpu.memory_space<vmem>>, %arg6: memref<1x128xf32, #tpu.memory_space<vmem>>, %arg7: memref<16x128xf32, #tpu.memory_space<vmem>>, %arg8: memref<16x32xbf16, #tpu.memory_space<vmem>>) attributes {dimension_semantics = [#tpu.dimension_semantics<parallel>, #tpu.dimension_semantics<arbitrary>], iteration_bounds = array<i64: 1, 1>, scalar_prefetch = 0 : i64, scratch_operands = 1 : i64, tpu.core_type = #tpu.core_type<tc>, window_params = [{transform_indices = @transform_0, window_bounds = array<i64: 16, 32>}, {pipeline_mode = #tpu.pipeline_mode<synchronous>, transform_indices = @transform_1, window_bounds = array<i64: 32, 32>}, {pipeline_mode = #tpu.pipeline_mode<synchronous>, transform_indices = @transform_2, window_bounds = array<i64: 3, 32>}, {transform_indices = @transform_3, window_bounds = array<i64: 32, 128>}, {transform_indices = @transform_4, window_bounds = array<i64: 1, 128>}, {transform_indices = @transform_5, window_bounds = array<i64: 16, 128>}]} {
    %c0_i32 = arith.constant 0 : i32
    %0 = arith.cmpi eq, %arg1, %c0_i32 : i32
    %1 = arith.extui %0 : i1 to i32
    %c0_i32_0 = arith.constant 0 : i32
    %2 = arith.cmpi ne, %1, %c0_i32_0 : i32
    scf.if %2 {
      %c0_8 = arith.constant 0 : index
      %c0_9 = arith.constant 0 : index
      %10 = vector.load %arg2[%c0_8, %c0_9] : memref<16x32xbf16, #tpu.memory_space<vmem>>, vector<16x32xbf16>
      %c0_10 = arith.constant 0 : index
      %c0_11 = arith.constant 0 : index
      %11 = vector.load %arg3[%c0_10, %c0_11] : memref<32x32xbf16, #tpu.memory_space<vmem>>, vector<32x32xbf16>
      %cst_12 = arith.constant dense<0.000000e+00> : vector<16x32xf32>
      %12 = tpu.matmul %10, %11, %cst_12 {dimension_numbers = #tpu.dot_dimension_numbers<[1], [0], [0], [1], [0, 0, 1, 1], [], []>} : vector<16x32xbf16>, vector<32x32xbf16>, vector<16x32xf32> -> vector<16x32xf32>
      %c0_13 = arith.constant 0 : index
      %c0_14 = arith.constant 0 : index
      %13 = vector.load %arg4[%c0_13, %c0_14] : memref<3x32xf32, #tpu.memory_space<vmem>>, vector<1x32xf32>
      %14 = vector.broadcast %13 : vector<1x32xf32> to vector<16x32xf32>
      %15 = arith.addf %12, %14 : vector<16x32xf32>
      %cst_15 = arith.constant 5.000000e-01 : f32
      %16 = vector.broadcast %cst_15 : f32 to vector<16x32xf32>
      %17 = arith.mulf %15, %16 : vector<16x32xf32>
      %cst_16 = arith.constant 0.707106769 : f32
      %18 = vector.broadcast %cst_16 : f32 to vector<16x32xf32>
      %19 = arith.mulf %15, %18 : vector<16x32xf32>
      %20 = math.erf %19 : vector<16x32xf32>
      %cst_17 = arith.constant 1.000000e+00 : f32
      %21 = vector.broadcast %cst_17 : f32 to vector<16x32xf32>
      %22 = arith.addf %21, %20 : vector<16x32xf32>
      %23 = arith.mulf %17, %22 : vector<16x32xf32>
      %cst_18 = arith.constant dense<0.000000e+00> : vector<16xf32>
      %24 = vector.multi_reduction <add>, %23, %cst_18 [1] : vector<16x32xf32> to vector<16xf32>
      %25 = vector.shape_cast %24 : vector<16xf32> to vector<16x1xf32>
      %cst_19 = arith.constant 3.200000e+01 : f32
      %26 = vector.broadcast %cst_19 : f32 to vector<16x1xf32>
      %27 = arith.divf %25, %26 : vector<16x1xf32>
      %28 = vector.broadcast %27 : vector<16x1xf32> to vector<16x32xf32>
      %29 = arith.subf %23, %28 : vector<16x32xf32>
      %30 = arith.mulf %29, %29 : vector<16x32xf32>
      %cst_20 = arith.constant dense<0.000000e+00> : vector<16xf32>
      %31 = vector.multi_reduction <add>, %30, %cst_20 [1] : vector<16x32xf32> to vector<16xf32>
      %32 = vector.shape_cast %31 : vector<16xf32> to vector<16x1xf32>
      %cst_21 = arith.constant 3.200000e+01 : f32
      %33 = vector.broadcast %cst_21 : f32 to vector<16x1xf32>
      %34 = arith.divf %32, %33 : vector<16x1xf32>
      %cst_22 = arith.constant 9.99999974E-6 : f32
      %35 = vector.broadcast %cst_22 : f32 to vector<16x1xf32>
      %36 = arith.addf %34, %35 : vector<16x1xf32>
      %37 = math.rsqrt %36 : vector<16x1xf32>
      %38 = vector.broadcast %37 : vector<16x1xf32> to vector<16x32xf32>
      %39 = arith.mulf %29, %38 : vector<16x32xf32>
      %c1 = arith.constant 1 : index
      %c0_23 = arith.constant 0 : index
      %40 = vector.load %arg4[%c1, %c0_23] : memref<3x32xf32, #tpu.memory_space<vmem>>, vector<1x32xf32>
      %41 = vector.broadcast %40 : vector<1x32xf32> to vector<16x32xf32>
      %42 = arith.mulf %39, %41 : vector<16x32xf32>
      %c2 = arith.constant 2 : index
      %c0_24 = arith.constant 0 : index
      %43 = vector.load %arg4[%c2, %c0_24] : memref<3x32xf32, #tpu.memory_space<vmem>>, vector<1x32xf32>
      %44 = vector.broadcast %43 : vector<1x32xf32> to vector<16x32xf32>
      %45 = arith.addf %42, %44 : vector<16x32xf32>
      %46 = arith.truncf %45 : vector<16x32xf32> to vector<16x32xbf16>
      %c0_25 = arith.constant 0 : index
      %c0_26 = arith.constant 0 : index
      %47 = vector.load %arg8[%c0_25, %c0_26] : memref<16x32xbf16, #tpu.memory_space<vmem>>, vector<16x32xbf16>
      tpu.vector_store %arg8[%c0_25, %c0_26], %46 {strides = array<i32>} : memref<16x32xbf16, #tpu.memory_space<vmem>>, vector<16x32xbf16>,
    } else {
    }
    %c0 = arith.constant 0 : index
    %c0_1 = arith.constant 0 : index
    %3 = vector.load %arg8[%c0, %c0_1] : memref<16x32xbf16, #tpu.memory_space<vmem>>, vector<16x32xbf16>
    %c0_2 = arith.constant 0 : index
    %c0_3 = arith.constant 0 : index
    %4 = vector.load %arg5[%c0_2, %c0_3] : memref<32x128xbf16, #tpu.memory_space<vmem>>, vector<32x128xbf16>
    %cst = arith.constant dense<0.000000e+00> : vector<16x128xf32>
    %5 = tpu.matmul %3, %4, %cst {dimension_numbers = #tpu.dot_dimension_numbers<[1], [0], [0], [1], [0, 0, 1, 1], [], []>} : vector<16x32xbf16>, vector<32x128xbf16>, vector<16x128xf32> -> vector<16x128xf32>
    %c0_4 = arith.constant 0 : index
    %c0_5 = arith.constant 0 : index
    %6 = vector.load %arg6[%c0_4, %c0_5] : memref<1x128xf32, #tpu.memory_space<vmem>>, vector<1x128xf32>
    %7 = vector.broadcast %6 : vector<1x128xf32> to vector<16x128xf32>
    %8 = arith.addf %5, %7 : vector<16x128xf32>
    %c0_6 = arith.constant 0 : index
    %c0_7 = arith.constant 0 : index
    %9 = vector.load %arg7[%c0_6, %c0_7] : memref<16x128xf32, #tpu.memory_space<vmem>>, vector<16x128xf32>
    tpu.vector_store %arg7[%c0_6, %c0_7], %8 {strides = array<i32>} : memref<16x128xf32, #tpu.memory_space<vmem>>, vector<16x128xf32>,
    return
  }
  func.func @transform_0(%arg0: i32, %arg1: i32) -> (i32, i32) {
    %c0_i32 = arith.constant 0 : i32
    %c0_i32_0 = arith.constant 0 : i32
    return %arg0, %c0_i32 : i32, i32
  }
  func.func @transform_1(%arg0: i32, %arg1: i32) -> (i32, i32) {
    %c0_i32 = arith.constant 0 : i32
    %c0_i32_0 = arith.constant 0 : i32
    %c0_i32_1 = arith.constant 0 : i32
    return %c0_i32, %c0_i32_0 : i32, i32
  }
  func.func @transform_2(%arg0: i32, %arg1: i32) -> (i32, i32) {
    %c0_i32 = arith.constant 0 : i32
    %c0_i32_0 = arith.constant 0 : i32
    %c0_i32_1 = arith.constant 0 : i32
    return %c0_i32, %c0_i32_0 : i32, i32
  }
  func.func @transform_3(%arg0: i32, %arg1: i32) -> (i32, i32) {
    %c0_i32 = arith.constant 0 : i32
    %c0_i32_0 = arith.constant 0 : i32
    return %c0_i32, %arg1 : i32, i32
  }
  func.func @transform_4(%arg0: i32, %arg1: i32) -> (i32, i32) {
    %c0_i32 = arith.constant 0 : i32
    %c0_i32_0 = arith.constant 0 : i32
    return %c0_i32, %arg1 : i32, i32
  }
  func.func @transform_5(%arg0: i32, %arg1: i32) -> (i32, i32) {
    %c0_i32 = arith.constant 0 : i32
    return %arg0, %arg1 : i32, i32
  }
}

</mosaic_0001>

<bundles_post_ra>
// kernel: tpu_custom_call.1
= control target key start
LH: loop header
LB: loop body
LE: loop exit
PB: predicated region body
PF: predicated region fallthrough
CT: control target
= control target key end

     0   :  { %10 = vsyncpa [#allocation4], 0  ;;  %s613_s0 = inlined_call_operand.hbm [shape: bf16[16,32], index: 0, kind: input, shape index: {}]   ;;  %s614_s1 = inlined_call_operand.hbm [shape: bf16[32,32], index: 1, kind: input, shape index: {}]   ;;  %s615_s2 = inlined_call_operand.hbm [shape: f32[3,32], index: 2, kind: input, shape index: {}]   ;;  %s616_s3 = inlined_call_operand.hbm [shape: bf16[32,128], index: 3, kind: input, shape index: {}]   ;;  %s617_s4 = inlined_call_operand.vmem [shape: f32[1,128], index: 4, kind: input, shape index: {}]   ;;  %s618_s5 = inlined_call_operand.hbm [shape: f32[16,128], index: 5, kind: output, shape index: {}]  }
   0x1   :  { %11 = vsyncpa [#allocation7], 0 }
   0x2   :  { %12 = vsyncpa [#allocation10], 0 }
   0x3   :  { %13 = vsyncpa [#allocation5], 0  ;;  %s31_s20 = sshll.u32 %s614_s1, 4  ;;  %s536_s21 = smov [#allocation6]   ;;  %s32_s20 = int_to_ptr.hbm [resolvable:$true] %s31_s20 }
   0x4   :  { %s33_s22 = sshll.u32 %s536_s21, 4  ;;  %s18_s25 = sshll.u32 %s613_s0, 4  ;;  %s34_s22 = int_to_ptr.vmem [resolvable:$true] %s33_s22  ;;  %s19_s25 = int_to_ptr.hbm [resolvable:$true] %s18_s25 }
   0x5   :  { %s537_s26 = smov 64   ;;  %s538_s27 = smov 4  }
   0x6   :  { %39 = dma.hbm_to_vmem [thread:$0]  %s32_s20, 256, %s34_s22, [#allocation7], %s537_s26, %s537_s26, %s538_s27  }
   0x7   :  { %s539_s28 = smov [#allocation3]   ;;  %s45_s7 = sshll.u32 %s615_s2, 4  ;;  %s46_s7 = int_to_ptr.hbm [resolvable:$true] %s45_s7 }
   0x8   :  { %s20_s29 = sshll.u32 %s539_s28, 4  ;;  %s55_s9 = sshll.u32 %s616_s3, 4  ;;  %s21_s29 = int_to_ptr.vmem [resolvable:$true] %s20_s29  ;;  %s56_s9 = int_to_ptr.hbm [resolvable:$true] %s55_s9 }
   0x9   :  { %26 = dma.hbm_to_vmem [thread:$0]  %s19_s25, 128, %s21_s29, [#allocation4], %s537_s26, %s537_s26, %s538_s27  }
   0xa   :  { %s540_s10 = smov [#allocation8]   ;;  %s541_s0 = smov [#allocation9]  }
   0xb   :  { %s47_s11 = sshll.u32 %s540_s10, 4  ;;  %s57_s12 = sshll.u32 %s541_s0, 4  ;;  %s48_s11 = int_to_ptr.vmem [resolvable:$true] %s47_s11  ;;  %s58_s12 = int_to_ptr.vmem [resolvable:$true] %s57_s12 }
   0xc   :  { %50 = dma.hbm_to_vmem [thread:$0]  %s46_s7, 64, %s48_s11, [#allocation7]  }
   0xd   :  { %63 = dma.hbm_to_vmem [thread:$0]  %s56_s9, 256, %s58_s12, [#allocation10], %s537_s26, %s537_s26, %s538_s27  }
   0xe   :  { %528 = dma.done.wait [#allocation4], 128  }
   0xf   :  { %529 = vsyncadd [#allocation4], 4294967168 }
  0x10   :  { %530 = dma.done.wait [#allocation7], 320  }
  0x11   :  { %531 = vsyncadd [#allocation7], 4294966976 }
  0x12   :  { %532 = dma.done.wait [#allocation10], 256  }
  0x13   :  { %533 = vsyncadd [#allocation10], 4294967040  ;;  %v380_v0 = vld [vmem:[#allocation6 + $0x8] sm:$0xff]  ;;  %v379_v1 = vld [vmem:[#allocation6] sm:$0xff]  ;;  %vm112_vm0 = vcmask 261120   ;;  %vm279_vm14 = vcmask 257024  }
  0x14   :  { %122 = vmatpush.bf16.msra.mxu0 %v380_v0  ;;  %v378_v2 = vld [vmem:[#allocation3] sm:$0xff]  ;;  %v394_v3 = vld [vmem:[#allocation8] ss:$0 sm:$0xff]  ;;  %s543_s13 = smov [#allocation11]   ;;  %s335_s17 = sshll.u32 %s618_s5, 4  ;;  %s336_s17 = int_to_ptr.hbm [resolvable:$true] %s335_s17 }
  0x15   :  { %s333_s14 = sshll.u32 %s543_s13, 4  ;;  %s544_s18 = smov 128   ;;  %s334_s14 = int_to_ptr.vmem [resolvable:$true] %s333_s14 }
  0x16   :  { %s545_s19 = smov 8  }
  0x18   :  { %123 = vmatpush.bf16.msra.mxu0 %v379_v1 }
  0x1b   :  { %362 = vmatmul.msk.bf16.vlgmr.msra.gmra.mxu0 %vm112_vm0, %v378_v2 }
  0x98   :  { %v125_v4 = vpop.f32.mrf.mxu0 }
  0x99   :  { %v589_v5 = vadd.f32 %v394_v3, %v125_v4 }
  0x9b   :  { %v132_v6 = vmul.f32 0.70710677, %v589_v5 }
  0x9d   :  { %v134_v7 = vmul.f32 %v132_v6, %v132_v6 }
  0x9f   :  { %v135_v8 = vmin.f32 %v134_v7, 16.0 }
  0xa0   :  { %v127_v9 = vpop.f32.mrf.mxu0 }
  0xa1   :  { %v136_v10 = vmul.f32 2.1237322e-06, %v135_v8  ;;  %v592_v11 = vadd.f32 %v394_v3, %v127_v9  ;;  %v147_v12 = vmul.f32 3.8918573e-05, %v135_v8 }
  0xa3   :  { %v137_v13 = vadd.f32 0.00028619796, %v136_v10  ;;  %v595_v14 = vmul.f32 0.70710677, %v592_v11  ;;  %v148_v15 = vadd.f32 0.001143296, %v147_v12 }
  0xa5   :  { %v138_v16 = vmul.f32 %v137_v13, %v135_v8  ;;  %v174_v17 = vmul.f32 %v595_v14, %v595_v14  ;;  %v149_v18 = vmul.f32 %v148_v15, %v135_v8  ;;  %v130_v13 = vmul.f32 0.5, %v589_v5 }
  0xa7   :  { %v175_v19 = vmin.f32 %v174_v17, 16.0  ;;  %v150_v20 = vadd.f32 0.014752088, %v149_v18  ;;  %v139_v21 = vadd.f32 0.0036580483, %v138_v16 }
  0xa9   :  { %v176_v22 = vmul.f32 2.1237322e-06, %v175_v19  ;;  %v187_v23 = vmul.f32 3.8918573e-05, %v175_v19  ;;  %v151_v24 = vmul.f32 %v150_v20, %v135_v8  ;;  %v140_v28 = vmul.f32 %v139_v21, %v135_v8 }
  0xab   :  { %v177_v25 = vadd.f32 0.00028619796, %v176_v22  ;;  %v188_v26 = vadd.f32 0.001143296, %v187_v23  ;;  %v152_v27 = vadd.f32 0.112945676, %v151_v24 }
  0xac   :  { %v141_v35 = vadd.f32 0.05243302, %v140_v28  ;;  %v131_v23 = vmul.f32 0.5, %v592_v11 }
  0xad   :  { %v178_v29 = vmul.f32 %v177_v25, %v175_v19  ;;  %v189_v30 = vmul.f32 %v188_v26, %v175_v19  ;;  %v153_v31 = vmul.f32 %v152_v27, %v135_v8  ;;  %v542_v26 = vmov 32.0  }
  0xae   :  { %v142_v41 = vmul.f32 %v141_v35, %v135_v8 }
  0xaf   :  { %v190_v32 = vadd.f32 0.014752088, %v189_v30  ;;  %v179_v33 = vadd.f32 0.0036580483, %v178_v29  ;;  %v154_v34 = vadd.f32 0.4994258, %v153_v31 }
  0xb0   :  { %v143_v45 = vadd.f32 0.18741608, %v142_v41 }
  0xb1   :  { %v191_v36 = vmul.f32 %v190_v32, %v175_v19  ;;  %v155_v37 = vmul.f32 %v154_v34, %v135_v8  ;;  %v180_v39 = vmul.f32 %v179_v33, %v175_v19 }
  0xb2   :  { %v144_v50 = vmul.f32 %v143_v45, %v135_v8 }
  0xb3   :  { %v192_v38 = vadd.f32 0.112945676, %v191_v36  ;;  %v156_v40 = vadd.f32 1.0, %v155_v37  ;;  %v181_v44 = vadd.f32 0.05243302, %v180_v39 }
  0xb4   :  { %v145_v55 = vadd.f32 1.1283791, %v144_v50 }
  0xb5   :  { %v193_v42 = vmul.f32 %v192_v38, %v175_v19  ;;  %398 = vrcp.f32 %v156_v40  ;;  %v182_v49 = vmul.f32 %v181_v44, %v175_v19  ;;  %v168_v54 = vand.u32 2147483648, %v156_v40  ;;  %v383_v44 = vld [vmem:[#allocation9 + $0x8] sm:$0xff] }
  0xb6   :  { %v166_v57 = vand.u32 2147483647, %v156_v40  ;;  %vm162_vm2 = vweird.f32 %v156_v40  ;;  %v146_v63 = vmul.f32 %v145_v55, %v132_v6  ;;  %319 = vmatpush.bf16.msra.mxu1 %v383_v44 }
  0xb7   :  { %v194_v43 = vadd.f32 0.4994258, %v193_v42  ;;  %v183_v53 = vadd.f32 0.18741608, %v182_v49  ;;  %v169_v61 = vor.u32 1.1754944e-38, %v168_v54 }
  0xb8   :  { %vm167_vm4 = vcmp.eq.f32.partialorder %v166_v57, 8.507059e+37  ;;  %v395_v57 = vld [vmem:[#allocation8 + $0x1] ss:$0 sm:$0xff] }
  0xb9   :  { %v195_v46 = vmul.f32 %v194_v43, %v175_v19  ;;  %v184_v60 = vmul.f32 %v183_v53, %v175_v19 }
  0xbb   :  { %v196_v47 = vadd.f32 1.0, %v195_v46  ;;  %v399_v48 = vpop.eup %398  ;;  %v185_v7 = vadd.f32 1.1283791, %v184_v60  ;;  %v396_v60 = vld [vmem:[#allocation8 + $0x2] ss:$0 sm:$0xff] }
  0xbc   :  { %v158_v51 = vmul.f32 %v399_v48, %v156_v40  ;;  %vm163_vm1 = vweird.f32 %v399_v48 }
  0xbd   :  { %400 = vrcp.f32 %v196_v47  ;;  %vm164_vm3 = vmor %vm162_vm2, %vm163_vm1  ;;  %v208_v4 = vand.u32 2147483648, %v196_v47  ;;  %v206_v9 = vand.u32 2147483647, %v196_v47  ;;  %vm202_vm6 = vweird.f32 %v196_v47 }
  0xbe   :  { %v159_v52 = vsub.f32 1.0, %v158_v51  ;;  %v186_v6 = vmul.f32 %v185_v7, %v595_v14  ;;  %402 = vrcp.f32 %v542_v26 }
  0xbf   :  { %v209_v16 = vor.u32 1.1754944e-38, %v208_v4  ;;  %vm207_vm8 = vcmp.eq.f32.partialorder %v206_v9, 8.507059e+37 }
  0xc0   :  { %v160_v56 = vmul.f32 %v399_v48, %v159_v52 }
  0xc2   :  { %v161_v59 = vadd.f32 %v399_v48, %v160_v56 }
  0xc3   :  { %v401_v58 = vpop.eup %400 }
  0xc4   :  { %v198_v62 = vmul.f32 %v401_v58, %v196_v47  ;;  %v165_v0 = vsel %vm164_vm3, %v399_v48, %v161_v59  ;;  %vm203_vm5 = vweird.f32 %v401_v58  ;;  %v403_v27 = vpop.eup %402  ;;  %v382_v47 = vld [vmem:[#allocation9] sm:$0xff] }
  0xc5   :  { %v170_v1 = vsel %vm167_vm4, %v169_v61, %v165_v0  ;;  %vm204_vm7 = vmor %vm202_vm6, %vm203_vm5  ;;  %v225_v14 = vmul.f32 32.0, %v403_v27  ;;  %vm229_vm9 = vweird.f32 %v403_v27  ;;  %320 = vmatpush.bf16.msra.mxu1 %v382_v47 }
  0xc6   :  { %v199_v2 = vsub.f32 1.0, %v198_v62  ;;  %v171_v3 = vmul.f32 %v170_v1, %v146_v63 }
  0xc7   :  { %v226_v28 = vsub.f32 1.0, %v225_v14 }
  0xc8   :  { %v200_v8 = vmul.f32 %v401_v58, %v199_v2  ;;  %v363_v10 = vclamps-f32 %v171_v3, 1.0 }
  0xc9   :  { %v227_v29 = vmul.f32 %v403_v27, %v226_v28 }
  0xca   :  { %v201_v12 = vadd.f32 %v401_v58, %v200_v8  ;;  %v214_v15 = vadd.f32 1.0, %v363_v10 }
  0xcb   :  { %v228_v30 = vadd.f32 %v403_v27, %v227_v29 }
  0xcc   :  { %v205_v17 = vsel %vm204_vm7, %v401_v58, %v201_v12  ;;  %v216_v18 = vmul.f32 %v214_v15, %v130_v13  ;;  %v397_v13 = vld [vmem:[%s617_s4] ss:$0 sm:$0xff] }
  0xcd   :  { %v210_v19 = vsel %vm207_vm8, %v209_v16, %v205_v17  ;;  %v230_v31 = vsel %vm229_vm9, %v403_v27, %v228_v30 }
  0xce   :  { %v211_v20 = vmul.f32 %v210_v19, %v186_v6  ;;  %v218_v21 = vsel %vm112_vm0, %v216_v18, 0.0 }
  0xcf   :  { %219 = vadd.xlane.f32.xlu0 %v218_v21 }
  0xd0   :  { %v364_v22 = vclamps-f32 %v211_v20, 1.0 }
  0xd2   :  { %v215_v24 = vadd.f32 1.0, %v364_v22 }
  0xd4   :  { %v217_v25 = vmul.f32 %v215_v24, %v131_v23 }
  0xd6   :  { %v221_v5 = vsel %vm112_vm0, %v217_v25, 0.0 }
  0xd7   :  { %222 = vadd.xlane.f32.xlu0 %v221_v5 }
 0x142   :  { %v220_v32 = vpop.xlane.xlu0 %219 }
 0x143   :  { %v231_v33 = vmul.f32 %v230_v31, %v220_v32 }
 0x145   :  { %v233_v34 = vsub.f32 %v216_v18, %v231_v33 }
 0x147   :  { %v235_v35 = vmul.f32 %v233_v34, %v233_v34 }
 0x149   :  { %v237_v11 = vsel %vm112_vm0, %v235_v35, 0.0 }
 0x14a   :  { %238 = vadd.xlane.f32.xlu1 %v237_v11  ;;  %v223_v36 = vpop.xlane.xlu0 %222 }
 0x14b   :  { %v232_v37 = vmul.f32 %v230_v31, %v223_v36 }
 0x14d   :  { %v234_v38 = vsub.f32 %v217_v25, %v232_v37 }
 0x14f   :  { %v236_v39 = vmul.f32 %v234_v38, %v234_v38 }
 0x151   :  { %v240_v40 = vsel %vm112_vm0, %v236_v39, 0.0 }
 0x152   :  { %241 = vadd.xlane.f32.xlu1 %v240_v40 }
 0x1bd   :  { %v239_v41 = vpop.xlane.xlu1 %238 }
 0x1be   :  { %v243_v42 = vmul.f32 %v239_v41, %v230_v31 }
 0x1c0   :  { %v245_v43 = vadd.f32 1e-05, %v243_v42 }
 0x1c2   :  { %404 = vrsqrt.f32 %v245_v43  ;;  %vm253_vm11 = vweird.f32 %v245_v43 }
 0x1c5   :  { %v242_v45 = vpop.xlane.xlu1 %241 }
 0x1c6   :  { %v244_v46 = vmul.f32 %v242_v45, %v230_v31 }
 0x1c8   :  { %v405_v48 = vpop.eup %404  ;;  %v246_v49 = vadd.f32 1e-05, %v244_v46 }
 0x1c9   :  { %v248_v50 = vmul.f32 %v405_v48, %v245_v43  ;;  %vm254_vm10 = vweird.f32 %v405_v48 }
 0x1ca   :  { %406 = vrsqrt.f32 %v246_v49  ;;  %vm255_vm12 = vmor %vm253_vm11, %vm254_vm10  ;;  %vm263_vm15 = vweird.f32 %v246_v49 }
 0x1cb   :  { %v249_v51 = vmul.f32 %v405_v48, %v248_v50 }
 0x1cd   :  { %v250_v52 = vmul.f32 0.5, %v249_v51 }
 0x1cf   :  { %v251_v53 = vsub.f32 1.5, %v250_v52 }
 0x1d0   :  { %v407_v54 = vpop.eup %406 }
 0x1d1   :  { %v252_v55 = vmul.f32 %v405_v48, %v251_v53  ;;  %v258_v56 = vmul.f32 %v407_v54, %v246_v49  ;;  %vm264_vm13 = vweird.f32 %v407_v54 }
 0x1d2   :  { %vm265_vm1 = vmor %vm263_vm15, %vm264_vm13 }
 0x1d3   :  { %v256_v58 = vsel %vm255_vm12, %v405_v48, %v252_v55  ;;  %v259_v59 = vmul.f32 %v407_v54, %v258_v56 }
 0x1d4   :  { %v267_v61 = vmul.f32 %v256_v58, %v233_v34 }
 0x1d5   :  { %v260_v62 = vmul.f32 0.5, %v259_v59 }
 0x1d6   :  { %v271_v63 = vmul.f32 %v395_v57, %v267_v61 }
 0x1d7   :  { %v261_v0 = vsub.f32 1.5, %v260_v62 }
 0x1d8   :  { %v275_v1 = vadd.f32 %v396_v60, %v271_v63 }
 0x1d9   :  { %v262_v2 = vmul.f32 %v407_v54, %v261_v0 }
 0x1da   :  { %v277_v3 = vpack.c.bf16 %v275_v1, %v275_v1 }
 0x1db   :  { %v266_v4 = vsel %vm265_vm1, %v407_v54, %v262_v2 }
 0x1dc   :  { %280 = vst.msk [vmem:[#allocation2] sm:$0xf] %vm279_vm14, %v277_v3  ;;  %v268_v7 = vmul.f32 %v266_v4, %v234_v38 }
 0x1de   :  { %v272_v8 = vmul.f32 %v395_v57, %v268_v7 }
 0x1e0   :  { %v276_v9 = vadd.f32 %v396_v60, %v272_v8 }
 0x1e2   :  { %v278_v10 = vpack.c.bf16 %v276_v9, %v276_v9 }
 0x1e4   :  { %281 = vst.msk [vmem:[#allocation2 + $0x4] sm:$0xf] %vm279_vm14, %v278_v10 }
 0x1eb   :  { %v381_v12 = vld [vmem:[#allocation2] sm:$0xff] }
 0x1ec   :  { %377 = vmatmul.msk.bf16.vlgmr.msra.gmra.mxu1 %vm112_vm0, %v381_v12 }
 0x269   :  { %v322_v15 = vpop.f32.mrf.mxu1 }
 0x26a   :  { %v323_v16 = vadd.f32 %v397_v13, %v322_v15 }
 0x26c   :  { %327 = vst [vmem:[#allocation11] sm:$0xff] %v323_v16 }
 0x271   :  { %v324_v6 = vpop.f32.mrf.mxu1 }
 0x272   :  { %v325_v17 = vadd.f32 %v397_v13, %v324_v6 }
 0x274   :  { %328 = vst [vmem:[#allocation11 + $0x8] sm:$0xff] %v325_v17 }
 0x275   :  { %341 = dma.vmem_to_hbm [thread:$0]  %s334_s14, 256, %s336_s17, [#allocation5], %s544_s18, %s544_s18, %s545_s19  }
 0x276   :  { %534 = dma.done.wait [#allocation5], 256  }
 0x277   :  { %535 = vsyncadd [#allocation5], 4294967040 }
 0x278   :  { %346 = vsyncpa [#allocation4], 1 }
 0x279   :  { %347 = vsyncpa [#allocation7], 1 }
 0x27a   :  { %348 = vsyncpa [#allocation10], 1 }
 0x27b   :  { %349 = vsyncpa [#allocation5], 1 }

</bundles_post_ra>
